<compile_context>
chip_gen: v7x
topology: tpu7x:2x2x1
jax: 0.10.0
libtpu: 0.0.40
codegen_flags: <defaults>
</compile_context>

<pallas_src>
import functools

import jax
import jax.numpy as jnp
from jax.experimental import pallas as pl
from jax.experimental.pallas import tpu as pltpu

POINT_SIZE = 11          # edge descriptor channels
H1 = 64                  # PointNet conv1 out
H2 = 128                 # PointNet conv2 out
EDGE_FEATURE_DIM = 32    # cfg.model.edge_feature_dim
OUT_PAD = 128            # lane-dense output width (>= EDGE_FEATURE_DIM)
MAX_TE = 2048            # edge-tile cap (multiple of 16 for bf16 sublanes)
ALIGN = 16               # bf16 sublane packing


def _round_up(x, m):
    return ((x + m - 1) // m) * m


def _edge_encoder_kernel(x_ref,
                         w1_ref, b1_ref,
                         w2_ref, b2_ref,
                         w3_ref, b3_ref,
                         out_ref):
    """One tile of TE edges: 3-layer pointwise MLP (conv1d(k=1)+BN folded)."""
    x = x_ref[...]                                    # (TE, 11) bf16
    # bf16 operands on the MXU, f32 accumulate; bias/ReLU in f32.
    h = jnp.dot(x, w1_ref[...],
                preferred_element_type=jnp.float32) + b1_ref[...]
    h = jnp.maximum(h, 0.0)                           # ReLU
    h = jnp.dot(h.astype(jnp.bfloat16), w2_ref[...],
                preferred_element_type=jnp.float32) + b2_ref[...]
    h = jnp.maximum(h, 0.0)                           # ReLU
    o = jnp.dot(h.astype(jnp.bfloat16), w3_ref[...],
                preferred_element_type=jnp.float32) + b3_ref[...]
    # torch.max over the point dim is identity (single point per edge).
    out_ref[...] = o.astype(out_ref.dtype)            # (TE, 128) lane-dense


@functools.partial(jax.jit, static_argnames=("out_dim",))
def edge_encoder_sgfn(descriptors, edges, params, out_dim=EDGE_FEATURE_DIM):
    """descriptors: [N, 11] float32, edges: [2, E] int32 -> [E, out_dim] float32."""
    w1, b1, w2, b2, w3, b3 = params
    E = edges.shape[1]
    if E == 0:
        return jnp.zeros((0, out_dim), jnp.float32)

    # ---- tile / grid selection -------------------------------------------
    E16 = _round_up(E, ALIGN)
    if E16 <= 1024:
        TE = E16                                   # single step, small problem
    else:
        # >= 2 grid steps so ("parallel",) shards across v7x's 2 TensorCores,
        # capped at MAX_TE to bound per-step VMEM (still ~2-3 MiB, fine on
        # v5e's 16 MiB default scoped limit too).
        TE = min(MAX_TE, _round_up((E16 + 1) // 2, ALIGN))
    E_pad = _round_up(E16, TE)
    pad = E_pad - E

    # ---- edge descriptor construction fused into the gather (XLA side) ----
    # Padded rows reuse index 0 (requires N >= 1): x_i == x_j -> diff 0 and
    # log(1) = 0, so padding is finite and discarded after the slice.
    src = jnp.pad(edges[0], (0, pad))
    dst = jnp.pad(edges[1], (0, pad))
    x_j = jnp.take(descriptors, src, axis=0)       # source nodes
    x_i = jnp.take(descriptors, dst, axis=0)       # target nodes
    edge_feat = jnp.concatenate(
        [x_i[:, 0:6] - x_j[:, 0:6],
         jnp.log(x_i[:, 6:11] / x_j[:, 6:11])], axis=1).astype(jnp.bfloat16)

    # ---- weights: bf16 MXU operands, W3/b3 padded to 128 lane-dense cols ---
    w1b = w1.astype(jnp.bfloat16)                                  # (11, 64)
    w2b = w2.astype(jnp.bfloat16)                                  # (64, 128)
    w3p = jnp.zeros((H2, OUT_PAD), jnp.bfloat16).at[:, :out_dim].set(
        w3.astype(jnp.bfloat16))                                   # (128, 128)
    b3p = jnp.zeros((1, OUT_PAD), jnp.float32).at[:, :out_dim].set(
        b3.reshape(1, -1))                                         # (1, 128)

    grid = (E_pad // TE,)
    rep = lambda i: (0, 0)  # weights/biases: constant block, stays resident

    weight_bytes = (2 * (POINT_SIZE * H1 + H1 * H2 + H2 * OUT_PAD)
                    + 4 * (H1 + H2 + OUT_PAD))
    cost = pl.CostEstimate(
        flops=2 * E_pad * (POINT_SIZE * H1 + H1 * H2 + H2 * OUT_PAD),
        transcendentals=0,                              # log moved to wrapper
        bytes_accessed=E_pad * (POINT_SIZE * 2 + OUT_PAD * 4) + weight_bytes,
    )

    out = pl.pallas_call(
        _edge_encoder_kernel,
        out_shape=jax.ShapeDtypeStruct((E_pad, OUT_PAD), jnp.float32),
        grid_spec=pltpu.PrefetchScalarGridSpec(
            num_scalar_prefetch=0,
            grid=grid,
            in_specs=[
                pl.BlockSpec((TE, POINT_SIZE), lambda i: (i, 0)),   # bf16 edge feats
                pl.BlockSpec((POINT_SIZE, H1), rep),
                pl.BlockSpec((1, H1), rep),
                pl.BlockSpec((H1, H2), rep),
                pl.BlockSpec((1, H2), rep),
                pl.BlockSpec((H2, OUT_PAD), rep),
                pl.BlockSpec((1, OUT_PAD), rep),
            ],
            out_specs=pl.BlockSpec((TE, OUT_PAD), lambda i: (i, 0)),
        ),
        compiler_params=pltpu.CompilerParams(
            dimension_semantics=("parallel",)),
        cost_estimate=cost,
    )(edge_feat, w1b, b1, w2b, b2, w3p, b3p)
    return out[:E, :out_dim]


# ---------------- deterministic parameter construction (synthetic) -------------

def _fold_bn(w, b, gamma, beta, mean, var, eps=1e-5):
    """Fold eval-mode BatchNorm1d into a kernel-size-1 conv: y=(xW+b-m)*s+beta."""
    scale = gamma / jnp.sqrt(var + eps)
    w_eff = w * scale[None, :]
    b_eff = (b - mean) * scale + beta
    return w_eff.astype(jnp.float32), b_eff.reshape(1, -1).astype(jnp.float32)


def make_params(key, out_dim=EDGE_FEATURE_DIM):
    ks = jax.random.split(key, 12)

    def conv(kw, kb, cin, cout):
        w = jax.random.normal(kw, (cin, cout), jnp.float32) * (1.0 / jnp.sqrt(cin))
        b = jax.random.normal(kb, (cout,), jnp.float32) * 0.01
        return w, b

    def bn(kg, kb, kv, c):
        gamma = 1.0 + 0.1 * jax.random.normal(kg, (c,), jnp.float32)
        beta = 0.05 * jax.random.normal(kb, (c,), jnp.float32)
        mean = 0.02 * jax.random.normal(kv, (c,), jnp.float32)
        var = jnp.ones((c,), jnp.float32) * 0.9
        return gamma, beta, mean, var

    w1, b1 = conv(ks[0], ks[1], POINT_SIZE, H1)
    w2, b2 = conv(ks[2], ks[3], H1, H2)
    w3, b3 = conv(ks[4], ks[5], H2, out_dim)
    g1, be1, m1, v1 = bn(ks[6], ks[7], ks[8], H1)
    g2, be2, m2, v2 = bn(ks[9], ks[10], ks[11], H2)
    g3, be3, m3, v3 = (jnp.ones((out_dim,), jnp.float32),
                       jnp.zeros((out_dim,), jnp.float32),
                       jnp.zeros((out_dim,), jnp.float32),
                       jnp.ones((out_dim,), jnp.float32))

    w1e, b1e = _fold_bn(w1, b1, g1, be1, m1, v1)
    w2e, b2e = _fold_bn(w2, b2, g2, be2, m2, v2)
    w3e, b3e = _fold_bn(w3, b3, g3, be3, m3, v3)
    return (w1e, b1e, w2e, b2e, w3e, b3e)


def reference(descriptors, edges, params):
    """Pure-JAX reference mirroring the PyTorch forward (eval mode) with the same
    bf16-operand / f32-accumulate matmul precision as the kernel."""
    w1, b1, w2, b2, w3, b3 = params
    x_j = descriptors[edges[0]]
    x_i = descriptors[edges[1]]
    edge = jnp.concatenate(
        [x_i[:, 0:6] - x_j[:, 0:6], jnp.log(x_i[:, 6:11] / x_j[:, 6:11])], axis=1)
    edge = edge.astype(jnp.bfloat16)
    h = jnp.maximum(
        jnp.dot(edge, w1.astype(jnp.bfloat16),
                preferred_element_type=jnp.float32) + b1, 0.0)
    h = jnp.maximum(
        jnp.dot(h.astype(jnp.bfloat16), w2.astype(jnp.bfloat16),
                preferred_element_type=jnp.float32) + b2, 0.0)
    return jnp.dot(h.astype(jnp.bfloat16), w3.astype(jnp.bfloat16),
                   preferred_element_type=jnp.float32) + b3


if __name__ == "__main__":
    key = jax.random.PRNGKey(0)
    k_desc, k_param = jax.random.split(key)

    N_NODES = 6
    N_EDGES = 10
    # Descriptors kept strictly positive so the log-ratio channels are finite
    # (matches how SGFN descriptors — centroid/std/size/volume/length — behave).
    descriptors = jax.random.uniform(
        k_desc, (N_NODES, POINT_SIZE), jnp.float32, minval=0.5, maxval=2.0)
    src = jnp.array([0, 1, 2, 3, 4, 5, 0, 2, 4, 1], jnp.int32)
    dst = jnp.array([1, 2, 3, 4, 5, 0, 3, 5, 1, 4], jnp.int32)
    edges = jnp.stack([src, dst], axis=0)  # [2, E]

    params = make_params(k_param)

    out = edge_encoder_sgfn(descriptors, edges, params)
    out = jax.block_until_ready(out)

    ref = reference(descriptors, edges, params)
    assert out.shape == (N_EDGES, EDGE_FEATURE_DIM), out.shape
    err = float(jnp.max(jnp.abs(out - ref)))
    assert jnp.allclose(out, ref, atol=2e-3, rtol=2e-3), err

    print("KERNEL_OK")
</pallas_src>

<mosaic_0001>
module attributes {stable_mosaic.version = 11 : i64} {
  func.func @_edge_encoder_kernel(%arg0: i32, %arg1: memref<16x11xbf16, #tpu.memory_space<vmem>>, %arg2: memref<11x64xbf16, #tpu.memory_space<vmem>>, %arg3: memref<1x64xf32, #tpu.memory_space<vmem>>, %arg4: memref<64x128xbf16, #tpu.memory_space<vmem>>, %arg5: memref<1x128xf32, #tpu.memory_space<vmem>>, %arg6: memref<128x128xbf16, #tpu.memory_space<vmem>>, %arg7: memref<1x128xf32, #tpu.memory_space<vmem>>, %arg8: memref<16x128xf32, #tpu.memory_space<vmem>>) attributes {dimension_semantics = [#tpu.dimension_semantics<parallel>], iteration_bounds = array<i64: 1>, scalar_prefetch = 0 : i64, scratch_operands = 0 : i64, tpu.core_type = #tpu.core_type<tc>, window_params = [{transform_indices = @transform_0, window_bounds = array<i64: 16, 11>}, {pipeline_mode = #tpu.pipeline_mode<synchronous>, transform_indices = @transform_1, window_bounds = array<i64: 11, 64>}, {pipeline_mode = #tpu.pipeline_mode<synchronous>, transform_indices = @transform_2, window_bounds = array<i64: 1, 64>}, {pipeline_mode = #tpu.pipeline_mode<synchronous>, transform_indices = @transform_3, window_bounds = array<i64: 64, 128>}, {pipeline_mode = #tpu.pipeline_mode<synchronous>, transform_indices = @transform_4, window_bounds = array<i64: 1, 128>}, {pipeline_mode = #tpu.pipeline_mode<synchronous>, transform_indices = @transform_5, window_bounds = array<i64: 128, 128>}, {pipeline_mode = #tpu.pipeline_mode<synchronous>, transform_indices = @transform_6, window_bounds = array<i64: 1, 128>}, {transform_indices = @transform_7, window_bounds = array<i64: 16, 128>}]} {
    %c0 = arith.constant 0 : index
    %c0_0 = arith.constant 0 : index
    %0 = vector.load %arg1[%c0, %c0_0] : memref<16x11xbf16, #tpu.memory_space<vmem>>, vector<16x11xbf16>
    %c0_1 = arith.constant 0 : index
    %c0_2 = arith.constant 0 : index
    %1 = vector.load %arg2[%c0_1, %c0_2] : memref<11x64xbf16, #tpu.memory_space<vmem>>, vector<11x64xbf16>
    %cst = arith.constant dense<0.000000e+00> : vector<16x64xf32>
    %2 = tpu.matmul %0, %1, %cst {dimension_numbers = #tpu.dot_dimension_numbers<[1], [0], [0], [1], [0, 0, 1, 1], [], []>} : vector<16x11xbf16>, vector<11x64xbf16>, vector<16x64xf32> -> vector<16x64xf32>
    %c0_3 = arith.constant 0 : index
    %c0_4 = arith.constant 0 : index
    %3 = vector.load %arg3[%c0_3, %c0_4] : memref<1x64xf32, #tpu.memory_space<vmem>>, vector<1x64xf32>
    %4 = vector.broadcast %3 : vector<1x64xf32> to vector<16x64xf32>
    %5 = arith.addf %2, %4 : vector<16x64xf32>
    %cst_5 = arith.constant 0.000000e+00 : f32
    %6 = vector.broadcast %cst_5 : f32 to vector<16x64xf32>
    %7 = arith.maximumf %5, %6 : vector<16x64xf32>
    %8 = arith.truncf %7 : vector<16x64xf32> to vector<16x64xbf16>
    %c0_6 = arith.constant 0 : index
    %c0_7 = arith.constant 0 : index
    %9 = vector.load %arg4[%c0_6, %c0_7] : memref<64x128xbf16, #tpu.memory_space<vmem>>, vector<64x128xbf16>
    %cst_8 = arith.constant dense<0.000000e+00> : vector<16x128xf32>
    %10 = tpu.matmul %8, %9, %cst_8 {dimension_numbers = #tpu.dot_dimension_numbers<[1], [0], [0], [1], [0, 0, 1, 1], [], []>} : vector<16x64xbf16>, vector<64x128xbf16>, vector<16x128xf32> -> vector<16x128xf32>
    %c0_9 = arith.constant 0 : index
    %c0_10 = arith.constant 0 : index
    %11 = vector.load %arg5[%c0_9, %c0_10] : memref<1x128xf32, #tpu.memory_space<vmem>>, vector<1x128xf32>
    %12 = vector.broadcast %11 : vector<1x128xf32> to vector<16x128xf32>
    %13 = arith.addf %10, %12 : vector<16x128xf32>
    %cst_11 = arith.constant 0.000000e+00 : f32
    %14 = vector.broadcast %cst_11 : f32 to vector<16x128xf32>
    %15 = arith.maximumf %13, %14 : vector<16x128xf32>
    %16 = arith.truncf %15 : vector<16x128xf32> to vector<16x128xbf16>
    %c0_12 = arith.constant 0 : index
    %c0_13 = arith.constant 0 : index
    %17 = vector.load %arg6[%c0_12, %c0_13] : memref<128x128xbf16, #tpu.memory_space<vmem>>, vector<128x128xbf16>
    %cst_14 = arith.constant dense<0.000000e+00> : vector<16x128xf32>
    %18 = tpu.matmul %16, %17, %cst_14 {dimension_numbers = #tpu.dot_dimension_numbers<[1], [0], [0], [1], [0, 0, 1, 1], [], []>} : vector<16x128xbf16>, vector<128x128xbf16>, vector<16x128xf32> -> vector<16x128xf32>
    %c0_15 = arith.constant 0 : index
    %c0_16 = arith.constant 0 : index
    %19 = vector.load %arg7[%c0_15, %c0_16] : memref<1x128xf32, #tpu.memory_space<vmem>>, vector<1x128xf32>
    %20 = vector.broadcast %19 : vector<1x128xf32> to vector<16x128xf32>
    %21 = arith.addf %18, %20 : vector<16x128xf32>
    %c0_17 = arith.constant 0 : index
    %c0_18 = arith.constant 0 : index
    %22 = vector.load %arg8[%c0_17, %c0_18] : memref<16x128xf32, #tpu.memory_space<vmem>>, vector<16x128xf32>
    tpu.vector_store %arg8[%c0_17, %c0_18], %21 {strides = array<i32>} : memref<16x128xf32, #tpu.memory_space<vmem>>, vector<16x128xf32>,
    return
  }
  func.func @transform_0(%arg0: i32) -> (i32, i32) {
    %c0_i32 = arith.constant 0 : i32
    %c0_i32_0 = arith.constant 0 : i32
    return %arg0, %c0_i32 : i32, i32
  }
  func.func @transform_1(%arg0: i32) -> (i32, i32) {
    %c0_i32 = arith.constant 0 : i32
    %c0_i32_0 = arith.constant 0 : i32
    %c0_i32_1 = arith.constant 0 : i32
    return %c0_i32, %c0_i32_0 : i32, i32
  }
  func.func @transform_2(%arg0: i32) -> (i32, i32) {
    %c0_i32 = arith.constant 0 : i32
    %c0_i32_0 = arith.constant 0 : i32
    %c0_i32_1 = arith.constant 0 : i32
    return %c0_i32, %c0_i32_0 : i32, i32
  }
  func.func @transform_3(%arg0: i32) -> (i32, i32) {
    %c0_i32 = arith.constant 0 : i32
    %c0_i32_0 = arith.constant 0 : i32
    %c0_i32_1 = arith.constant 0 : i32
    return %c0_i32, %c0_i32_0 : i32, i32
  }
  func.func @transform_4(%arg0: i32) -> (i32, i32) {
    %c0_i32 = arith.constant 0 : i32
    %c0_i32_0 = arith.constant 0 : i32
    %c0_i32_1 = arith.constant 0 : i32
    return %c0_i32, %c0_i32_0 : i32, i32
  }
  func.func @transform_5(%arg0: i32) -> (i32, i32) {
    %c0_i32 = arith.constant 0 : i32
    %c0_i32_0 = arith.constant 0 : i32
    %c0_i32_1 = arith.constant 0 : i32
    return %c0_i32, %c0_i32_0 : i32, i32
  }
  func.func @transform_6(%arg0: i32) -> (i32, i32) {
    %c0_i32 = arith.constant 0 : i32
    %c0_i32_0 = arith.constant 0 : i32
    %c0_i32_1 = arith.constant 0 : i32
    return %c0_i32, %c0_i32_0 : i32, i32
  }
  func.func @transform_7(%arg0: i32) -> (i32, i32) {
    %c0_i32 = arith.constant 0 : i32
    %c0_i32_0 = arith.constant 0 : i32
    return %arg0, %c0_i32 : i32, i32
  }
}

</mosaic_0001>

<bundles_post_ra>
// kernel: edge_encoder_sgfn.1
= control target key start
LH: loop header
LB: loop body
LE: loop exit
PB: predicated region body
PF: predicated region fallthrough
CT: control target
= control target key end

     0   :  { %vm53_vm0 = vcmask 1044480   ;;  %v438_v0 = vmov 0.0   ;;  %vm54_vm1 = vcmask 1045504   ;;  %v439_v2 = vmov 65535   ;;  %s547_s0 = inlined_call_operand.vmem [shape: bf16[16,11], index: 0, kind: input, shape index: {}]   ;;  %s548_s1 = inlined_call_operand.vmem [shape: bf16[11,64], index: 1, kind: input, shape index: {}]   ;;  %s549_s2 = inlined_call_operand.vmem [shape: f32[1,64], index: 2, kind: input, shape index: {}]   ;;  %s550_s3 = inlined_call_operand.vmem [shape: bf16[64,128], index: 3, kind: input, shape index: {}]   ;;  %s551_s4 = inlined_call_operand.vmem [shape: f32[1,128], index: 4, kind: input, shape index: {}]   ;;  %s552_s5 = inlined_call_operand.vmem [shape: bf16[128,128], index: 5, kind: input, shape index: {}]   ;;  %s553_s6 = inlined_call_operand.vmem [shape: f32[1,128], index: 6, kind: input, shape index: {}]   ;;  %s554_s7 = inlined_call_operand.hbm [shape: f32[16,128], index: 7, kind: output, shape index: {}]  }
   0x1   :  { %356 = vmatprep.subr.bf16.mxu1 %v438_v0  ;;  %v400_v1 = vld [vmem:[%s548_s1] sm:$0x3f]   ;;  %374 = vmatprep.subr.bf16.mxu0 %v438_v0  ;;  %v55_v3 = vsel %vm53_vm0, 4294967295, %v439_v2  ;;  %vm440_vm2 = vmmov 0   ;;  %vm49_vm3 = vcmask 89088   ;;  %v403_v8 = vld [vmem:[%s550_s3 + $0x8] sm:$0xff]  }
   0x2   :  { %358 = vmatprep.mubr.msk.bf16.mxu1 %vm440_vm2, %v438_v0  ;;  %390 = vmatprep.mubr.msk.bf16.mxu0 %vm440_vm2, %v438_v0  ;;  %v56_v4 = vsel %vm54_vm1, %v55_v3, 0  ;;  %v401_v6 = vld [vmem:[%s547_s0] sm:$0xff]  }
   0x3   :  { %v58_v5 = vand.u32 %v400_v1, %v56_v4  ;;  %v402_v7 = vld [vmem:[%s550_s3] sm:$0xff]  }
   0x5   :  { %357 = vmatpush3.bf16.msra.mxu1 %v58_v5 }
   0x6   :  { %362 = vmatprep.subr.bf16.mxu1 %v438_v0 }
   0x8   :  { %359 = vmatmul.mubr.msk.bf16.vlgmr.msra.gmra.mrb[0].mxu1 %vm49_vm3, %v401_v6 }
   0x9   :  { %363 = vmatpush3.bf16.msra.mxu1 %v402_v7  ;;  %370 = vmatprep.mubr.msk.bf16.mxu1 %vm440_vm2, %v438_v0 }
   0xa   :  { %364 = vmatprep.subr.bf16.mxu1 %v438_v0 }
   0xb   :  { %12 = vsyncpa [#allocation3], 0  ;;  %v404_v9 = vld [vmem:[%s550_s3 + $0x10] sm:$0xff]   ;;  %v405_v10 = vld [vmem:[%s550_s3 + $0x18] sm:$0xff]   ;;  %vm143_vm4 = vcmask 523264  }
   0xc   :  { %v406_v11 = vld [vmem:[%s552_s5] sm:$0xff]   ;;  %v407_v12 = vld [vmem:[%s552_s5 + $0x8] sm:$0xff]   ;;  %v408_v13 = vld [vmem:[%s552_s5 + $0x10] sm:$0xff]  }
   0xd   :  { %365 = vmatpush3.bf16.msra.mxu1 %v403_v8  ;;  %375 = vmatpush3.bf16.msra.mxu0 %v406_v11  ;;  %v409_v14 = vld [vmem:[%s552_s5 + $0x18] sm:$0xff]   ;;  %v410_v15 = vld [vmem:[%s552_s5 + $0x20] sm:$0xff]   ;;  %v411_v16 = vld [vmem:[%s552_s5 + $0x28] sm:$0xff]  }
   0xe   :  { %366 = vmatprep.subr.bf16.mxu1 %v438_v0  ;;  %376 = vmatprep.subr.bf16.mxu0 %v438_v0  ;;  %v321_v17 = vld [vmem:[%s549_s2] ss:$0 sm:$0xff]  ;;  %v412_v27 = vld [vmem:[%s552_s5 + $0x30] sm:$0xff]   ;;  %v413_v28 = vld [vmem:[%s552_s5 + $0x38] sm:$0xff]   ;;  %s441_s5 = smov [#allocation2]  }
   0xf   :  { %v325_v29 = vld [vmem:[%s551_s4] ss:$0 sm:$0xff]  ;;  %s310_s30 = sshll.u32 %s441_s5, 4  ;;  %s311_s30 = int_to_ptr.vmem [resolvable:$true] %s310_s30 }
  0x10   :  { %v331_v39 = vld [vmem:[%s553_s6] ss:$0 sm:$0xff]  ;;  %s414_s4 = scalar_lea.vmem %s311_s30, 256  ;;  %p419_p1 = scmp.lt.s32.totalorder %s311_s30, %s311_s30 }
  0x11   :  { %367 = vmatpush3.bf16.msra.mxu1 %v404_v9  ;;  %377 = vmatpush3.bf16.msra.mxu0 %v407_v12  ;;  %p415_p0 = scmp.ne.s32.totalorder %s311_s30, %s414_s4  ;;  %p420_p2 = scmp.lt.s32.totalorder %s414_s4, %s414_s4 }
  0x12   :  { %368 = vmatprep.subr.bf16.mxu1 %v438_v0  ;;  %378 = vmatprep.subr.bf16.mxu0 %v438_v0 }
  0x13   :  { %p421_p3 = por %p420_p2, %p419_p1 }
  0x15   :  { %369 = vmatpush3.bf16.msra.mxu1 %v405_v10  ;;  %379 = vmatpush3.bf16.msra.mxu0 %v408_v13  ;;  %p422_p4 = pnand %p421_p3, %p415_p0 }
  0x16   :  { %380 = vmatprep.subr.bf16.mxu0 %v438_v0 }
  0x19   :  { %381 = vmatpush3.bf16.msra.mxu0 %v409_v14 }
  0x1a   :  { %382 = vmatprep.subr.bf16.mxu0 %v438_v0 }
  0x1d   :  { %383 = vmatpush3.bf16.msra.mxu0 %v410_v15 }
  0x1e   :  { %384 = vmatprep.subr.bf16.mxu0 %v438_v0 }
  0x21   :  { %385 = vmatpush3.bf16.msra.mxu0 %v411_v16 }
  0x22   :  { %386 = vmatprep.subr.bf16.mxu0 %v438_v0 }
  0x25   :  { %387 = vmatpush3.bf16.msra.mxu0 %v412_v27 }
  0x26   :  { %388 = vmatprep.subr.bf16.mxu0 %v438_v0 }
  0x29   :  { %389 = vmatpush3.bf16.msra.mxu0 %v413_v28 }
  0xdb   :  { %v94_v18 = vpop.f32.mrb[0].mxu1 }
  0xdc   :  { %v95_v19 = vadd.f32 %v321_v17, %v94_v18  ;;  %v360_v20 = vpop.f32.mrb[1].mxu1 }
  0xdd   :  { %v97_v21 = vpop.f32.mrb[2].mxu1 }
  0xde   :  { %v98_v22 = vadd.f32 %v321_v17, %v97_v21  ;;  %v361_v23 = vpop.f32.mrb[3].mxu1  ;;  %v101_v24 = vmax.f32 %v95_v19, 0.0 }
  0xe0   :  { %v102_v25 = vmax.f32 %v98_v22, 0.0 }
  0xe2   :  { %v103_v26 = vpack.c.bf16 %v102_v25, %v101_v24 }
  0xe4   :  { %371 = vmatmul.mubr.msk.bf16.vlgmr.msra.gmra.mrb[4].mxu1 %vm143_vm4, %v103_v26 }
 0x1b7   :  { %v181_v30 = vpop.f32.mrb[4].mxu1 }
 0x1b8   :  { %v182_v31 = vadd.f32 %v325_v29, %v181_v30  ;;  %v372_v32 = vpop.f32.mrb[5].mxu1 }
 0x1b9   :  { %v184_v33 = vpop.f32.mrb[6].mxu1 }
 0x1ba   :  { %v185_v34 = vadd.f32 %v325_v29, %v184_v33  ;;  %v373_v35 = vpop.f32.mrb[7].mxu1  ;;  %v188_v36 = vmax.f32 %v182_v31, 0.0 }
 0x1bc   :  { %v189_v37 = vmax.f32 %v185_v34, 0.0 }
 0x1be   :  { %v190_v38 = vpack.c.bf16 %v189_v37, %v188_v36 }
 0x1c0   :  { %391 = vmatmul.mubr.bf16.vlgmr.msra.gmra.mrb[0].mxu0 %v190_v38 }
 0x293   :  { %v296_v40 = vpop.f32.mrb[0].mxu0 }
 0x294   :  { %v297_v41 = vadd.f32 %v331_v39, %v296_v40  ;;  %v392_v42 = vpop.f32.mrb[1].mxu0 }
 0x295   :  { %v299_v43 = vpop.f32.mrb[2].mxu0 }
 0x296   :  { %303 = vst [vmem:[#allocation2] sm:$0xff] %v297_v41  ;;  %v300_v44 = vadd.f32 %v331_v39, %v299_v43  ;;  %v393_v45 = vpop.f32.mrb[3].mxu0 }
 0x298   :  { %304 = vst [vmem:[#allocation2 + $0x8] sm:$0xff] %v300_v44 }
 0x299   :  { %425 = shalt.err (!%p422_p4)
}
 0x29a   :  { %s426_s0 = scalar_lea.hbm %s554_s7, 256 }
 0x29b   :  { %p427_p5 = scmp.ne.s32.totalorder %s554_s7, %s426_s0  ;;  %p430_p6 = scmp.lt.u32.totalorder %s426_s0, %s554_s7 }
 0x29d   :  { %p432_p7 = pnand %p430_p6, %p427_p5 }
 0x29f   :  { %435 = shalt.err (!%p432_p7)
}
 0x2a0   :  { %s442_s13 = smov 128   ;;  %s443_s14 = smov 8  }
 0x2a1   :  { %316 = dma.vmem_to_hbm [thread:$0]  %s311_s30, 256, %s554_s7, [#allocation3], %s442_s13, %s442_s13, %s443_s14  }
 0x2a2   :  { %436 = dma.done.wait [#allocation3], 256  }
 0x2a3   :  { %437 = vsyncadd [#allocation3], 4294967040 }
 0x2a4   :  { %320 = vsyncpa [#allocation3], 1 }

</bundles_post_ra>
